<compile_context>
chip_gen: v7x
topology: tpu7x:2x2x1
jax: 0.10.0
libtpu: 0.0.40
codegen_flags: <defaults>
</compile_context>

<pallas_src>
import math

import jax
import jax.numpy as jnp
from jax.experimental import pallas as pl
from jax.experimental.pallas import tpu as pltpu


def _make_mmlstm_kernel(n_mod, H):
    """Build a kernel closure for `n_mod` modalities, hidden size H.

    Ref order: x_0..x_{M-1}, hx_0..hx_{M-1}, cx_0..cx_{M-1}, wx, wh, b, out.
      x_m : (B, I)          modality input (fp32 from caller)
      hx_m: (B, H)          hidden state (fp32)
      cx_m: (B, H)          cell state (fp32)
      wx  : (M, I, 4H)      per-modality input weights (storage dtype)
      wh  : (H, 4H)         shared hidden weights (fp32)
      b   : (M, 1, 4H)      pre-summed bias b_ih[m] + b_hh (fp32)
      out : (B, 2*M*H)      fused [nhx_0..nhx_{M-1} | ncx_0..ncx_{M-1}]
    """

    def kernel(*refs):
        x_refs = refs[:n_mod]
        h_refs = refs[n_mod:2 * n_mod]
        c_refs = refs[2 * n_mod:3 * n_mod]
        wx_ref, wh_ref, b_ref = refs[3 * n_mod:3 * n_mod + 3]
        out_ref = refs[3 * n_mod + 3]

        wh = wh_ref[...]                       # fp32, shared by all modalities
        wx_dtype = wx_ref.dtype

        nhx_parts, ncx_parts = [], []
        for m in range(n_mod):                 # python-unrolled, n_mod is small
            x = x_refs[m][...].astype(wx_dtype)        # bf16 MXU path optional
            hx = h_refs[m][...]                         # recurrent path fp32
            gates = (
                jnp.dot(x, wx_ref[m], preferred_element_type=jnp.float32)
                + jnp.dot(hx, wh, preferred_element_type=jnp.float32)
                + b_ref[m]
            )
            # Dense transcendentals over the whole (B, 4H) block, then slice
            # the activated values (torch .chunk(4, 1) order: i, f, c, o).
            sig = jax.nn.sigmoid(gates)
            th = jnp.tanh(gates)
            i_g = sig[:, 0 * H:1 * H]
            f_g = sig[:, 1 * H:2 * H]
            c_g = th[:, 2 * H:3 * H]
            o_g = sig[:, 3 * H:4 * H]
            cx = c_refs[m][...]                         # fp32 state math
            ncx = f_g * cx + i_g * c_g
            nhx = o_g * jnp.tanh(ncx)
            nhx_parts.append(nhx)
            ncx_parts.append(ncx)

        # One lane-dense store: (B, 2*n_mod*H) == (8, 128) at demo sizes.
        out_ref[...] = jnp.concatenate(nhx_parts + ncx_parts,
                                       axis=-1).astype(out_ref.dtype)

    return kernel


def mmlstm_layer_step(xs, hxs, cxs, wx, wh, b):
    """All modalities of one layer in a single grid-less pallas_call.

    xs / hxs / cxs: lists of per-modality (B, I) / (B, H) / (B, H) arrays.
    wx: (M, I, 4H), wh: (H, 4H), b: (M, 1, 4H).
    Returns (nhx_list, ncx_list) of per-modality (B, H) fp32 arrays.
    """
    n_mod = len(xs)
    B = xs[0].shape[0]
    H = cxs[0].shape[-1]

    out = pl.pallas_call(
        _make_mmlstm_kernel(n_mod, H),
        out_shape=jax.ShapeDtypeStruct((B, 2 * n_mod * H), jnp.float32),
    )(*xs, *hxs, *cxs, wx, wh, b)

    nhx = [out[:, m * H:(m + 1) * H] for m in range(n_mod)]
    ncx = [out[:, (n_mod + m) * H:(n_mod + m + 1) * H] for m in range(n_mod)]
    return nhx, ncx


def _init_linear(key, in_features, out_features):
    """torch.nn.Linear default init: U(-k, k), k = 1/sqrt(in_features).
    Returns W transposed to (in, out) plus bias reshaped to (1, out), fp32."""
    k = 1.0 / math.sqrt(in_features)
    kw, kb = jax.random.split(key)
    w_t = jax.random.uniform(kw, (in_features, out_features), jnp.float32, -k, k)
    bias = jax.random.uniform(kb, (1, out_features), jnp.float32, -k, k)
    return w_t, bias


class MMLSTMCellPallas:
    """JAX/Pallas port of MMLSTMCell.

    Note: the reference PyTorch forward feeds the raw modality input to every
    layer's w_ih and the layer-i hidden state to w_hh; its shapes are only
    consistent for n_layers == 1 (or input_size == 4*hidden_size), which is
    what the demo exercises.
    """

    def __init__(self, input_size, hidden_size, n_layers, n_modalities, key,
                 dropout=None, dtype=jnp.float32):
        self.input_size = input_size
        self.hidden_size = hidden_size
        self.n_layers = n_layers
        self.n_modalities = n_modalities
        self.dtype = dtype   # storage dtype for W_ih / x-path MXU operands
        # TODO(synk): dropout omitted -- in the reference forward nhx is
        # appended to the output BEFORE dropout and never fed onward, so
        # dropout has no effect on the returned values.

        keys = jax.random.split(key, n_modalities * n_layers + n_layers)
        ki = 0
        # per-modality input weights (kept fp32 for the pure-JAX reference)
        self.w_ih = []
        for _ in range(n_modalities):
            layers = []
            for i in range(n_layers):
                in_f = input_size if i == 0 else 4 * hidden_size
                layers.append(_init_linear(keys[ki], in_f, 4 * hidden_size))
                ki += 1
            self.w_ih.append(layers)
        # shared hidden weights (always fp32: recurrent path stays fp32)
        self.w_hh = []
        for i in range(n_layers):
            in_f = hidden_size if i == 0 else 4 * hidden_size
            self.w_hh.append(_init_linear(keys[ki], in_f, 4 * hidden_size))
            ki += 1

        # Per-layer fused kernel parameters (built once at init, no per-call
        # stacking): wx[i] = stack_m W_ih[m][i] in `dtype`; wh[i] fp32;
        # b[i] = stack_m (b_ih[m][i] + b_hh[i]) pre-summed, fp32.
        self.wx, self.wh, self.b = [], [], []
        for i in range(n_layers):
            whh_t, bhh = self.w_hh[i]
            self.wx.append(jnp.stack(
                [self.w_ih[m][i][0] for m in range(n_modalities)],
                axis=0).astype(dtype))
            self.wh.append(whh_t)
            self.b.append(jnp.stack(
                [self.w_ih[m][i][1] + bhh for m in range(n_modalities)],
                axis=0))

    def __call__(self, input_list, hidden_list):
        n_mod = self.n_modalities
        per_layer = []
        for i in range(self.n_layers):
            xs = [input_list[m] for m in range(n_mod)]
            hxs = [hidden_list[m][0][i] for m in range(n_mod)]
            cxs = [hidden_list[m][1][i] for m in range(n_mod)]
            per_layer.append(
                mmlstm_layer_step(xs, hxs, cxs,
                                  self.wx[i], self.wh[i], self.b[i]))
        res = []
        for m in range(n_mod):
            hy = jnp.stack([per_layer[i][0][m] for i in range(self.n_layers)], 0)
            cy = jnp.stack([per_layer[i][1][m] for i in range(self.n_layers)], 0)
            res.append((hy, cy))
        return res


def _reference_forward(cell, input_list, hidden_list):
    """Pure-JAX fp32 reference mirroring the PyTorch forward, for validation."""
    res = []
    for m in range(cell.n_modalities):
        hy, cy = [], []
        for i in range(cell.n_layers):
            hx = hidden_list[m][0][i]
            cx = hidden_list[m][1][i]
            w_ih_t, b_ih = cell.w_ih[m][i]
            w_hh_t, b_hh = cell.w_hh[i]
            gates = input_list[m] @ w_ih_t + b_ih + hx @ w_hh_t + b_hh
            H = cell.hidden_size
            i_g = jax.nn.sigmoid(gates[:, 0 * H:1 * H])
            f_g = jax.nn.sigmoid(gates[:, 1 * H:2 * H])
            c_g = jnp.tanh(gates[:, 2 * H:3 * H])
            o_g = jax.nn.sigmoid(gates[:, 3 * H:4 * H])
            ncx = f_g * cx + i_g * c_g
            nhx = o_g * jnp.tanh(ncx)
            cy.append(ncx)
            hy.append(nhx)
        res.append((jnp.stack(hy, 0), jnp.stack(cy, 0)))
    return res


if __name__ == "__main__":
    batch = 8
    input_size = 64
    hidden_size = 32
    n_layers = 1        # reference forward is only shape-consistent for 1 layer
    n_modalities = 2

    root = jax.random.PRNGKey(0)
    k_params, k_data = jax.random.split(root)

    data_keys = jax.random.split(k_data, n_modalities * 3)
    input_list, hidden_list = [], []
    for m in range(n_modalities):
        kx, kh, kc = data_keys[3 * m:3 * m + 3]
        input_list.append(jax.random.normal(kx, (batch, input_size), jnp.float32))
        h0 = jax.random.normal(kh, (n_layers, batch, hidden_size), jnp.float32)
        c0 = jax.random.normal(kc, (n_layers, batch, hidden_size), jnp.float32)
        hidden_list.append((h0, c0))

    # fp32 cell: tight check against the pure-JAX reference.
    cell = MMLSTMCellPallas(input_size, hidden_size, n_layers, n_modalities,
                            key=k_params, dtype=jnp.float32)
    out = jax.block_until_ready(cell(input_list, hidden_list))
    ref = _reference_forward(cell, input_list, hidden_list)
    for (hy, cy), (rhy, rcy) in zip(out, ref):
        assert hy.shape == (n_layers, batch, hidden_size)
        assert cy.shape == (n_layers, batch, hidden_size)
        assert jnp.allclose(hy, rhy, atol=1e-4, rtol=1e-4)
        assert jnp.allclose(cy, rcy, atol=1e-4, rtol=1e-4)

    # bf16 input-projection weights / fp32 recurrent path: loose smoke check.
    cell_bf16 = MMLSTMCellPallas(input_size, hidden_size, n_layers, n_modalities,
                                 key=k_params, dtype=jnp.bfloat16)
    out_bf16 = jax.block_until_ready(cell_bf16(input_list, hidden_list))
    for (hy, cy), (rhy, rcy) in zip(out_bf16, ref):
        assert jnp.allclose(hy, rhy, atol=1e-1, rtol=1e-1)
        assert jnp.allclose(cy, rcy, atol=1e-1, rtol=1e-1)

    print("KERNEL_OK")
</pallas_src>

<mosaic_0001>
module attributes {stable_mosaic.version = 11 : i64} {
  func.func @kernel(%arg0: memref<8x64xf32, #tpu.memory_space<vmem>>, %arg1: memref<8x64xf32, #tpu.memory_space<vmem>>, %arg2: memref<8x32xf32, #tpu.memory_space<vmem>>, %arg3: memref<8x32xf32, #tpu.memory_space<vmem>>, %arg4: memref<8x32xf32, #tpu.memory_space<vmem>>, %arg5: memref<8x32xf32, #tpu.memory_space<vmem>>, %arg6: memref<2x64x128xf32, #tpu.memory_space<vmem>>, %arg7: memref<32x128xf32, #tpu.memory_space<vmem>>, %arg8: memref<2x1x128xf32, #tpu.memory_space<vmem>>, %arg9: memref<8x128xf32, #tpu.memory_space<vmem>>) attributes {dimension_semantics = [], scalar_prefetch = 0 : i64, scratch_operands = 0 : i64, tpu.core_type = #tpu.core_type<tc>} {
    %c0 = arith.constant 0 : index
    %c0_0 = arith.constant 0 : index
    %0 = vector.load %arg7[%c0, %c0_0] : memref<32x128xf32, #tpu.memory_space<vmem>>, vector<32x128xf32>
    %c0_1 = arith.constant 0 : index
    %c0_2 = arith.constant 0 : index
    %1 = vector.load %arg0[%c0_1, %c0_2] : memref<8x64xf32, #tpu.memory_space<vmem>>, vector<8x64xf32>
    %c0_3 = arith.constant 0 : index
    %c0_4 = arith.constant 0 : index
    %2 = vector.load %arg2[%c0_3, %c0_4] : memref<8x32xf32, #tpu.memory_space<vmem>>, vector<8x32xf32>
    %c0_5 = arith.constant 0 : index
    %c0_6 = arith.constant 0 : index
    %c0_7 = arith.constant 0 : index
    %3 = vector.load %arg6[%c0_5, %c0_6, %c0_7] : memref<2x64x128xf32, #tpu.memory_space<vmem>>, vector<1x64x128xf32>
    %4 = vector.shape_cast %3 : vector<1x64x128xf32> to vector<64x128xf32>
    %cst = arith.constant dense<0.000000e+00> : vector<8x128xf32>
    %5 = tpu.matmul %1, %4, %cst {dimension_numbers = #tpu.dot_dimension_numbers<[1], [0], [0], [1], [0, 0, 1, 1], [], []>} : vector<8x64xf32>, vector<64x128xf32>, vector<8x128xf32> -> vector<8x128xf32>
    %cst_8 = arith.constant dense<0.000000e+00> : vector<8x128xf32>
    %6 = tpu.matmul %2, %0, %cst_8 {dimension_numbers = #tpu.dot_dimension_numbers<[1], [0], [0], [1], [0, 0, 1, 1], [], []>} : vector<8x32xf32>, vector<32x128xf32>, vector<8x128xf32> -> vector<8x128xf32>
    %7 = arith.addf %5, %6 : vector<8x128xf32>
    %c0_9 = arith.constant 0 : index
    %c0_10 = arith.constant 0 : index
    %c0_11 = arith.constant 0 : index
    %8 = vector.load %arg8[%c0_9, %c0_10, %c0_11] : memref<2x1x128xf32, #tpu.memory_space<vmem>>, vector<1x1x128xf32>
    %9 = vector.shape_cast %8 : vector<1x1x128xf32> to vector<1x128xf32>
    %10 = vector.broadcast %9 : vector<1x128xf32> to vector<8x128xf32>
    %11 = arith.addf %7, %10 : vector<8x128xf32>
    %12 = arith.negf %11 : vector<8x128xf32>
    %13 = math.exp %12 : vector<8x128xf32>
    %cst_12 = arith.constant 1.000000e+00 : f32
    %14 = vector.broadcast %cst_12 : f32 to vector<8x128xf32>
    %15 = arith.addf %14, %13 : vector<8x128xf32>
    %16 = arith.divf %14, %15 : vector<8x128xf32>
    %17 = math.tanh %11 : vector<8x128xf32>
    %18 = vector.extract_strided_slice %16 {offsets = [0, 0], sizes = [8, 32], strides = [1, 1]} : vector<8x128xf32> to vector<8x32xf32>
    %19 = vector.extract_strided_slice %16 {offsets = [0, 32], sizes = [8, 32], strides = [1, 1]} : vector<8x128xf32> to vector<8x32xf32>
    %20 = vector.extract_strided_slice %17 {offsets = [0, 64], sizes = [8, 32], strides = [1, 1]} : vector<8x128xf32> to vector<8x32xf32>
    %21 = vector.extract_strided_slice %16 {offsets = [0, 96], sizes = [8, 32], strides = [1, 1]} : vector<8x128xf32> to vector<8x32xf32>
    %c0_13 = arith.constant 0 : index
    %c0_14 = arith.constant 0 : index
    %22 = vector.load %arg4[%c0_13, %c0_14] : memref<8x32xf32, #tpu.memory_space<vmem>>, vector<8x32xf32>
    %23 = arith.mulf %19, %22 : vector<8x32xf32>
    %24 = arith.mulf %18, %20 : vector<8x32xf32>
    %25 = arith.addf %23, %24 : vector<8x32xf32>
    %26 = math.tanh %25 : vector<8x32xf32>
    %27 = arith.mulf %21, %26 : vector<8x32xf32>
    %c0_15 = arith.constant 0 : index
    %c0_16 = arith.constant 0 : index
    %28 = vector.load %arg1[%c0_15, %c0_16] : memref<8x64xf32, #tpu.memory_space<vmem>>, vector<8x64xf32>
    %c0_17 = arith.constant 0 : index
    %c0_18 = arith.constant 0 : index
    %29 = vector.load %arg3[%c0_17, %c0_18] : memref<8x32xf32, #tpu.memory_space<vmem>>, vector<8x32xf32>
    %c1 = arith.constant 1 : index
    %c0_19 = arith.constant 0 : index
    %c0_20 = arith.constant 0 : index
    %30 = vector.load %arg6[%c1, %c0_19, %c0_20] : memref<2x64x128xf32, #tpu.memory_space<vmem>>, vector<1x64x128xf32>
    %31 = vector.shape_cast %30 : vector<1x64x128xf32> to vector<64x128xf32>
    %cst_21 = arith.constant dense<0.000000e+00> : vector<8x128xf32>
    %32 = tpu.matmul %28, %31, %cst_21 {dimension_numbers = #tpu.dot_dimension_numbers<[1], [0], [0], [1], [0, 0, 1, 1], [], []>} : vector<8x64xf32>, vector<64x128xf32>, vector<8x128xf32> -> vector<8x128xf32>
    %cst_22 = arith.constant dense<0.000000e+00> : vector<8x128xf32>
    %33 = tpu.matmul %29, %0, %cst_22 {dimension_numbers = #tpu.dot_dimension_numbers<[1], [0], [0], [1], [0, 0, 1, 1], [], []>} : vector<8x32xf32>, vector<32x128xf32>, vector<8x128xf32> -> vector<8x128xf32>
    %34 = arith.addf %32, %33 : vector<8x128xf32>
    %c1_23 = arith.constant 1 : index
    %c0_24 = arith.constant 0 : index
    %c0_25 = arith.constant 0 : index
    %35 = vector.load %arg8[%c1_23, %c0_24, %c0_25] : memref<2x1x128xf32, #tpu.memory_space<vmem>>, vector<1x1x128xf32>
    %36 = vector.shape_cast %35 : vector<1x1x128xf32> to vector<1x128xf32>
    %37 = vector.broadcast %36 : vector<1x128xf32> to vector<8x128xf32>
    %38 = arith.addf %34, %37 : vector<8x128xf32>
    %39 = arith.negf %38 : vector<8x128xf32>
    %40 = math.exp %39 : vector<8x128xf32>
    %cst_26 = arith.constant 1.000000e+00 : f32
    %41 = vector.broadcast %cst_26 : f32 to vector<8x128xf32>
    %42 = arith.addf %41, %40 : vector<8x128xf32>
    %43 = arith.divf %41, %42 : vector<8x128xf32>
    %44 = math.tanh %38 : vector<8x128xf32>
    %45 = vector.extract_strided_slice %43 {offsets = [0, 0], sizes = [8, 32], strides = [1, 1]} : vector<8x128xf32> to vector<8x32xf32>
    %46 = vector.extract_strided_slice %43 {offsets = [0, 32], sizes = [8, 32], strides = [1, 1]} : vector<8x128xf32> to vector<8x32xf32>
    %47 = vector.extract_strided_slice %44 {offsets = [0, 64], sizes = [8, 32], strides = [1, 1]} : vector<8x128xf32> to vector<8x32xf32>
    %48 = vector.extract_strided_slice %43 {offsets = [0, 96], sizes = [8, 32], strides = [1, 1]} : vector<8x128xf32> to vector<8x32xf32>
    %c0_27 = arith.constant 0 : index
    %c0_28 = arith.constant 0 : index
    %49 = vector.load %arg5[%c0_27, %c0_28] : memref<8x32xf32, #tpu.memory_space<vmem>>, vector<8x32xf32>
    %50 = arith.mulf %46, %49 : vector<8x32xf32>
    %51 = arith.mulf %45, %47 : vector<8x32xf32>
    %52 = arith.addf %50, %51 : vector<8x32xf32>
    %53 = math.tanh %52 : vector<8x32xf32>
    %54 = arith.mulf %48, %53 : vector<8x32xf32>
    %55 = tpu.concatenate %27, %54, %25, %52 in 1 : vector<8x32xf32>, vector<8x32xf32>, vector<8x32xf32>, vector<8x32xf32> -> vector<8x128xf32>
    %c0_29 = arith.constant 0 : index
    %c0_30 = arith.constant 0 : index
    %56 = vector.load %arg9[%c0_29, %c0_30] : memref<8x128xf32, #tpu.memory_space<vmem>>, vector<8x128xf32>
    tpu.vector_store %arg9[%c0_29, %c0_30], %55 {strides = array<i32>} : memref<8x128xf32, #tpu.memory_space<vmem>>, vector<8x128xf32>,
    return
  }
}

</mosaic_0001>

<bundles_post_ra>
// kernel: tpu_custom_call.1
= control target key start
LH: loop header
LB: loop body
LE: loop exit
PB: predicated region body
PF: predicated region fallthrough
CT: control target
= control target key end

     0   :  { %14 = vsyncpa [#allocation3], 0  ;;  %s1061_s0 = inlined_call_operand.hbm [shape: f32[8,64], index: 0, kind: input, shape index: {}]   ;;  %s1062_s1 = inlined_call_operand.hbm [shape: f32[8,64], index: 1, kind: input, shape index: {}]   ;;  %s1063_s2 = inlined_call_operand.hbm [shape: f32[8,32], index: 2, kind: input, shape index: {}]   ;;  %s1064_s3 = inlined_call_operand.vmem [shape: f32[8,32], index: 3, kind: input, shape index: {}]   ;;  %s1065_s4 = inlined_call_operand.hbm [shape: f32[8,32], index: 4, kind: input, shape index: {}]   ;;  %s1066_s5 = inlined_call_operand.vmem [shape: f32[8,32], index: 5, kind: input, shape index: {}]   ;;  %s1067_s6 = inlined_call_operand.hbm [shape: f32[2,64,128], index: 6, kind: input, shape index: {}]   ;;  %s1068_s7 = inlined_call_operand.hbm [shape: f32[32,128], index: 7, kind: input, shape index: {}]   ;;  %s1069_s8 = inlined_call_operand.vmem [shape: f32[2,1,128], index: 8, kind: input, shape index: {}]   ;;  %s1070_s9 = inlined_call_operand.hbm [shape: f32[8,128], index: 9, kind: output, shape index: {}]  }
   0x1   :  { %15 = vsyncpa [#allocation6], 0 }
   0x2   :  { %16 = vsyncpa [#allocation9], 0 }
   0x3   :  { %17 = vsyncpa [#allocation12], 0 }
   0x4   :  { %18 = vsyncpa [#allocation4], 0  ;;  %s867_s30 = smov [#allocation5]   ;;  %s868_s11 = smov [#allocation8]  }
   0x5   :  { %s35_s10 = sshll.u32 %s867_s30, 4  ;;  %s57_s12 = sshll.u32 %s868_s11, 4  ;;  %s36_s10 = int_to_ptr.vmem [resolvable:$true] %s35_s10  ;;  %s58_s12 = int_to_ptr.vmem [resolvable:$true] %s57_s12 }
   0x6   :  { %s703_s15 = scalar_lea.hbm %s1062_s1, 128 }
   0x7   :  { %p704_p0 = scmp.ne.s32.totalorder %s1062_s1, %s703_s15  ;;  %p707_p1 = scmp.lt.u32.totalorder %s703_s15, %s1062_s1 }
   0x9   :  { %p709_p2 = pnand %p707_p1, %p704_p0 }
   0xb   :  { %712 = shalt.err (!%p709_p2)
}
   0xc   :  { %s713_s20 = scalar_lea.vmem %s36_s10, 128  ;;  %p718_p4 = scmp.lt.s32.totalorder %s36_s10, %s36_s10 }
   0xd   :  { %p714_p3 = scmp.ne.s32.totalorder %s36_s10, %s713_s20  ;;  %p719_p5 = scmp.lt.s32.totalorder %s713_s20, %s713_s20 }
   0xf   :  { %p720_p6 = por %p719_p5, %p718_p4 }
  0x11   :  { %p721_p7 = pnand %p720_p6, %p714_p3 }
  0x13   :  { %724 = shalt.err (!%p721_p7)
}
  0x14   :  { %38 = dma.hbm_to_vmem [thread:$0]  %s1062_s1, 128, %s36_s10, [#allocation6]  }
  0x15   :  { %s725_s25 = scalar_lea.hbm %s1065_s4, 128 }
  0x16   :  { %p726_p8 = scmp.ne.s32.totalorder %s1065_s4, %s725_s25  ;;  %p729_p9 = scmp.lt.u32.totalorder %s725_s25, %s1065_s4 }
  0x18   :  { %p731_p10 = pnand %p729_p9, %p726_p8 }
  0x1a   :  { %734 = shalt.err (!%p731_p10)
}
  0x1b   :  { %s735_s30 = scalar_lea.vmem %s58_s12, 128  ;;  %p740_p12 = scmp.lt.s32.totalorder %s58_s12, %s58_s12 }
  0x1c   :  { %p736_p11 = scmp.ne.s32.totalorder %s58_s12, %s735_s30  ;;  %p741_p13 = scmp.lt.s32.totalorder %s735_s30, %s735_s30 }
  0x1e   :  { %p742_p0 = por %p741_p13, %p740_p12 }
  0x20   :  { %p743_p1 = pnand %p742_p0, %p736_p11 }
  0x22   :  { %746 = shalt.err (!%p743_p1)
}
  0x23   :  { %60 = dma.hbm_to_vmem [thread:$0]  %s1065_s4, 128, %s58_s12, [#allocation9]  }
  0x24   :  { %s869_s11 = smov [#allocation2]   ;;  %s870_s14 = smov [#allocation7]  }
  0x25   :  { %s25_s13 = sshll.u32 %s869_s11, 4  ;;  %s45_s15 = sshll.u32 %s870_s14, 4  ;;  %s26_s13 = int_to_ptr.vmem [resolvable:$true] %s25_s13  ;;  %s46_s15 = int_to_ptr.vmem [resolvable:$true] %s45_s15 }
  0x26   :  { %s747_s18 = scalar_lea.hbm %s1061_s0, 128 }
  0x27   :  { %p748_p2 = scmp.ne.s32.totalorder %s1061_s0, %s747_s18  ;;  %p751_p3 = scmp.lt.u32.totalorder %s747_s18, %s1061_s0 }
  0x29   :  { %p753_p4 = pnand %p751_p3, %p748_p2 }
  0x2b   :  { %756 = shalt.err (!%p753_p4)
}
  0x2c   :  { %s757_s4 = scalar_lea.vmem %s26_s13, 128  ;;  %p762_p6 = scmp.lt.s32.totalorder %s26_s13, %s26_s13 }
  0x2d   :  { %p758_p5 = scmp.ne.s32.totalorder %s26_s13, %s757_s4  ;;  %p763_p7 = scmp.lt.s32.totalorder %s757_s4, %s757_s4 }
  0x2f   :  { %p764_p8 = por %p763_p7, %p762_p6 }
  0x31   :  { %p765_p9 = pnand %p764_p8, %p758_p5 }
  0x33   :  { %768 = shalt.err (!%p765_p9)
}
  0x34   :  { %28 = dma.hbm_to_vmem [thread:$0]  %s1061_s0, 128, %s26_s13, [#allocation3]  }
  0x35   :  { %s769_s26 = scalar_lea.hbm %s1063_s2, 128 }
  0x36   :  { %p770_p10 = scmp.ne.s32.totalorder %s1063_s2, %s769_s26  ;;  %p773_p11 = scmp.lt.u32.totalorder %s769_s26, %s1063_s2 }
  0x38   :  { %p775_p12 = pnand %p773_p11, %p770_p10 }
  0x3a   :  { %778 = shalt.err (!%p775_p12)
}
  0x3b   :  { %s779_s1 = scalar_lea.vmem %s46_s15, 128  ;;  %p784_p0 = scmp.lt.s32.totalorder %s46_s15, %s46_s15 }
  0x3c   :  { %p780_p13 = scmp.ne.s32.totalorder %s46_s15, %s779_s1  ;;  %p785_p1 = scmp.lt.s32.totalorder %s779_s1, %s779_s1 }
  0x3e   :  { %p786_p2 = por %p785_p1, %p784_p0 }
  0x40   :  { %p787_p3 = pnand %p786_p2, %p780_p13 }
  0x42   :  { %790 = shalt.err (!%p787_p3)
}
  0x43   :  { %48 = dma.hbm_to_vmem [thread:$0]  %s1063_s2, 128, %s46_s15, [#allocation6]  }
  0x44   :  { %s871_s11 = smov [#allocation10]   ;;  %s791_s17 = scalar_lea.hbm %s1067_s6, 2048 }
  0x45   :  { %s68_s13 = sshll.u32 %s871_s11, 4  ;;  %p792_p4 = scmp.ne.s32.totalorder %s1067_s6, %s791_s17  ;;  %s69_s13 = int_to_ptr.vmem [resolvable:$true] %s68_s13 }
  0x46   :  { %p795_p5 = scmp.lt.u32.totalorder %s791_s17, %s1067_s6 }
  0x48   :  { %p797_p6 = pnand %p795_p5, %p792_p4 }
  0x4a   :  { %800 = shalt.err (!%p797_p6)
}
  0x4b   :  { %s801_s22 = scalar_lea.vmem %s69_s13, 2048  ;;  %p806_p8 = scmp.lt.s32.totalorder %s69_s13, %s69_s13 }
  0x4c   :  { %p802_p7 = scmp.ne.s32.totalorder %s69_s13, %s801_s22  ;;  %p807_p9 = scmp.lt.s32.totalorder %s801_s22, %s801_s22 }
  0x4e   :  { %p808_p10 = por %p807_p9, %p806_p8 }
  0x50   :  { %p809_p11 = pnand %p808_p10, %p802_p7 }
  0x52   :  { %812 = shalt.err (!%p809_p11)
}
  0x53   :  { %s872_s2 = smov 128   ;;  %s873_s15 = smov 8  }
  0x54   :  { %74 = dma.hbm_to_vmem [thread:$0]  %s1067_s6, 2048, %s69_s13, [#allocation9], %s872_s2, %s872_s2, %s873_s15  }
  0x55   :  { %s874_s23 = smov [#allocation11]   ;;  %s813_s27 = scalar_lea.hbm %s1068_s7, 512 }
  0x56   :  { %s80_s24 = sshll.u32 %s874_s23, 4  ;;  %p814_p12 = scmp.ne.s32.totalorder %s1068_s7, %s813_s27  ;;  %s81_s24 = int_to_ptr.vmem [resolvable:$true] %s80_s24 }
  0x57   :  { %p817_p13 = scmp.lt.u32.totalorder %s813_s27, %s1068_s7 }
  0x59   :  { %p819_p0 = pnand %p817_p13, %p814_p12 }
  0x5b   :  { %822 = shalt.err (!%p819_p0)
}
  0x5c   :  { %s823_s0 = scalar_lea.vmem %s81_s24, 512  ;;  %p828_p2 = scmp.lt.s32.totalorder %s81_s24, %s81_s24 }
  0x5d   :  { %p824_p1 = scmp.ne.s32.totalorder %s81_s24, %s823_s0  ;;  %p829_p3 = scmp.lt.s32.totalorder %s823_s0, %s823_s0 }
  0x5f   :  { %p830_p4 = por %p829_p3, %p828_p2 }
  0x61   :  { %p831_p5 = pnand %p830_p4, %p824_p1 }
  0x63   :  { %834 = shalt.err (!%p831_p5)
}
  0x64   :  { %86 = dma.hbm_to_vmem [thread:$0]  %s1068_s7, 512, %s81_s24, [#allocation12], %s872_s2, %s872_s2, %s873_s15  }
  0x65   :  { %857 = dma.done.wait [#allocation3], 128  }
  0x66   :  { %858 = vsyncadd [#allocation3], 4294967168 }
  0x67   :  { %859 = dma.done.wait [#allocation6], 256  }
  0x68   :  { %860 = vsyncadd [#allocation6], 4294967040 }
  0x69   :  { %861 = dma.done.wait [#allocation9], 2176  }
  0x6a   :  { %862 = vsyncadd [#allocation9], 4294965120 }
  0x6b   :  { %863 = dma.done.wait [#allocation12], 512  }
  0x6c   :  { %864 = vsyncadd [#allocation12], 4294966784  ;;  %v875_v0 = vmov 0.0|0.0   ;;  %vm876_vm0 = vmmov 0   ;;  %v877_v1 = vmov 0.0   ;;  %v107_v2 = vld [vmem:[#allocation11] sm:$0xff] }
  0x6d   :  { %637 = vmatprep.subr.bf16.mxu1 %v875_v0  ;;  %655 = vmatprep.subr.bf16.mxu0 %v875_v0  ;;  %v108_v3 = vld [vmem:[#allocation11 + $0x8] sm:$0xff]  ;;  %v109_v4 = vld [vmem:[#allocation11 + $0x10] sm:$0xff]  ;;  %v110_v6 = vld [vmem:[#allocation11 + $0x18] sm:$0xff]  ;;  %vm121_vm1 = vcmask 261120   ;;  %s878_s13 = smov 32   ;;  %vm195_vm2 = vcmask 523264  }
  0x6e   :  { %585 = vmatprep.mubr.msk.f32.mxu1 %vm876_vm0, %v877_v1  ;;  %615 = vmatprep.mubr.msk.f32.mxu0 %vm876_vm0, %v877_v1  ;;  %v638_v5 = vpack.c.bf16 %v108_v3, %v107_v2  ;;  %v641_v7 = vpack.c.bf16 %v110_v6, %v109_v4  ;;  %v113_v8 = vld [vmem:[#allocation10] sm:$0xff]  ;;  %v114_v9 = vld [vmem:[#allocation10 + $0x8] sm:$0xff]  ;;  %v112_v12 = vld [vmem:[#allocation7] sm:$0xff]  ;;  %s879_s19 = smov 64   ;;  %vm519_vm3 = vcmask 785408  }
  0x6f   :  { %v309_v10 = vld [vmem:[#allocation10 + $0x40] sm:$0xff]  ;;  %v310_v11 = vld [vmem:[#allocation10 + $0x48] sm:$0xff]  ;;  %v644_v13 = vpack.c.bf16 %v114_v9, %v113_v8  ;;  %v115_v16 = vld [vmem:[#allocation10 + $0x10] sm:$0xff] }
  0x70   :  { %639 = vmatpush3.bf16.msra.mxu1 %v638_v5  ;;  %657 = vmatpush3.bf16.msra.mxu0 %v638_v5  ;;  %v307_v14 = vld [vmem:[%s1064_s3] sm:$0xff]  ;;  %v662_v15 = vpack.c.bf16 %v310_v11, %v309_v10  ;;  %v116_v17 = vld [vmem:[#allocation10 + $0x18] sm:$0xff]  ;;  %v311_v18 = vld [vmem:[#allocation10 + $0x50] sm:$0xff] }
  0x71   :  { %640 = vmatprep.subr.bf16.mxu1 %v875_v0  ;;  %658 = vmatprep.subr.bf16.mxu0 %v875_v0  ;;  %v312_v19 = vld [vmem:[#allocation10 + $0x58] sm:$0xff]  ;;  %v647_v21 = vpack.c.bf16 %v116_v17, %v115_v16  ;;  %v117_v23 = vld [vmem:[#allocation10 + $0x20] sm:$0xff]  ;;  %v118_v25 = vld [vmem:[#allocation10 + $0x28] sm:$0xff] }
  0x72   :  { %v284_v20 = vld [vmem:[#allocation8] sm:$0xff]  ;;  %v665_v22 = vpack.c.bf16 %v312_v19, %v311_v18  ;;  %v479_v24 = vld [vmem:[%s1066_s5] sm:$0xff]  ;;  %v314_v27 = vld [vmem:[#allocation10 + $0x68] sm:$0xff]  ;;  %v650_v28 = vpack.c.bf16 %v118_v25, %v117_v23 }
  0x73   :  { %286 = vrot.lane.b32.xlu1 %v284_v20, %s878_s13  ;;  %v313_v26 = vld [vmem:[#allocation10 + $0x60] sm:$0xff]  ;;  %v119_v30 = vld [vmem:[#allocation10 + $0x30] sm:$0xff]  ;;  %v120_v31 = vld [vmem:[#allocation10 + $0x38] sm:$0xff] }
  0x74   :  { %642 = vmatpush3.bf16.msra.mxu1 %v641_v7  ;;  %660 = vmatpush3.bf16.msra.mxu0 %v641_v7  ;;  %v668_v29 = vpack.c.bf16 %v314_v27, %v313_v26  ;;  %v315_v32 = vld [vmem:[#allocation10 + $0x70] sm:$0xff]  ;;  %v316_v33 = vld [vmem:[#allocation10 + $0x78] sm:$0xff]  ;;  %v653_v34 = vpack.c.bf16 %v120_v31, %v119_v30  ;;  %v111_v36 = vld [vmem:[#allocation2] sm:$0xff] }
  0x75   :  { %643 = vmatprep.subr.bf16.mxu1 %v875_v0  ;;  %661 = vmatprep.subr.bf16.mxu0 %v875_v0  ;;  %v671_v35 = vpack.c.bf16 %v316_v33, %v315_v32  ;;  %v306_v37 = vld [vmem:[#allocation5] sm:$0xff]  ;;  %v542_v43 = vld [vmem:[%s1069_s8] ss:$0 sm:$0xff]  ;;  %v547_v49 = vld [vmem:[%s1069_s8 + $0x1] ss:$0 sm:$0xff]  ;;  %s880_s8 = smov [#allocation13]  }
  0x76   :  { %s528_s20 = sshll.u32 %s880_s8, 4  ;;  %s529_s20 = int_to_ptr.vmem [resolvable:$true] %s528_s20 }
  0x77   :  { %586 = vmatmul.mubr.msk.f32.vlgmr.msra.gmra.mrb[0].mxu1 %vm121_vm1, %v112_v12  ;;  %616 = vmatmul.mubr.msk.f32.vlgmr.msra.gmra.mrb[0].mxu0 %vm121_vm1, %v307_v14  ;;  %s835_s21 = scalar_lea.vmem %s529_s20, 128  ;;  %p840_p7 = scmp.lt.s32.totalorder %s529_s20, %s529_s20 }
  0x78   :  { %645 = vmatpush3.bf16.msra.mxu1 %v644_v13  ;;  %663 = vmatpush3.bf16.msra.mxu0 %v662_v15  ;;  %p836_p6 = scmp.ne.s32.totalorder %s529_s20, %s835_s21  ;;  %p841_p8 = scmp.lt.s32.totalorder %s835_s21, %s835_s21 }
  0x79   :  { %646 = vmatprep.subr.bf16.mxu1 %v875_v0  ;;  %664 = vmatprep.subr.bf16.mxu0 %v875_v0 }
  0x7a   :  { %604 = vmatprep.mubr.msk.f32.mxu1 %vm876_vm0, %v877_v1  ;;  %634 = vmatprep.mubr.msk.f32.mxu0 %vm876_vm0, %v877_v1  ;;  %p842_p9 = por %p841_p8, %p840_p7 }
  0x7b   :  { %481 = vrot.lane.b32.xlu1 %v479_v24, %s878_s13 }
  0x7c   :  { %648 = vmatpush3.bf16.msra.mxu1 %v647_v21  ;;  %666 = vmatpush3.bf16.msra.mxu0 %v665_v22  ;;  %p843_p10 = pnand %p842_p9, %p836_p6 }
  0x7d   :  { %649 = vmatprep.subr.bf16.mxu1 %v875_v0  ;;  %667 = vmatprep.subr.bf16.mxu0 %v875_v0 }
  0x80   :  { %651 = vmatpush3.bf16.msra.mxu1 %v650_v28  ;;  %669 = vmatpush3.bf16.msra.mxu0 %v668_v29 }
  0x81   :  { %652 = vmatprep.subr.bf16.mxu1 %v875_v0  ;;  %670 = vmatprep.subr.bf16.mxu0 %v875_v0 }
  0x84   :  { %654 = vmatpush3.bf16.msra.mxu1 %v653_v34  ;;  %672 = vmatpush3.bf16.msra.mxu0 %v671_v35 }
  0x87   :  { %605 = vmatmul.mubr.msk.f32.vlgmr.msra.gmra.mrb[2].mxu1 %vm195_vm2, %v111_v36  ;;  %635 = vmatmul.mubr.msk.f32.vlgmr.msra.gmra.mrb[2].mxu0 %vm195_vm2, %v306_v37 }
  0xe5   :  { %v287_v2 = vpop.permute.xlu1 %286 }
  0xed   :  { %v482_v4 = vpop.permute.xlu1 %481 }
 0x14a   :  { %v191_v38 = vpop.f32.mrb[0].mxu1  ;;  %v386_v39 = vpop.f32.mrb[0].mxu0 }
 0x14b   :  { %v587_v40 = vpop.f32.mrb[1].mxu1  ;;  %v617_v41 = vpop.f32.mrb[1].mxu0 }
 0x15a   :  { %v265_v42 = vpop.f32.mrb[2].mxu1  ;;  %v459_v44 = vpop.f32.mrb[2].mxu0 }
 0x15b   :  { %v266_v45 = vadd.f32 %v265_v42, %v191_v38  ;;  %v460_v46 = vadd.f32 %v459_v44, %v386_v39  ;;  %v606_v47 = vpop.f32.mrb[3].mxu1  ;;  %v636_v48 = vpop.f32.mrb[3].mxu0 }
 0x15d   :  { %v276_v50 = vadd.f32 %v542_v43, %v266_v45  ;;  %v471_v51 = vadd.f32 %v547_v49, %v460_v46 }
 0x15f   :  { %687 = vtanh.f32 %v276_v50  ;;  %v543_v54 = vmul.f32 -1.442695, %v276_v50  ;;  %v548_v55 = vmul.f32 -1.442695, %v471_v51 }
 0x160   :  { %689 = vtanh.f32 %v471_v51 }
 0x161   :  { %691 = vpow2.f32 %v543_v54 }
 0x162   :  { %693 = vpow2.f32 %v548_v55 }
 0x169   :  { %v688_v52 = vpop.eup %687 }
 0x16a   :  { %291 = vrot.lane.b32.xlu0 %v688_v52, %s879_s19  ;;  %v690_v53 = vpop.eup %689 }
 0x16b   :  { %v692_v56 = vpop.eup %691 }
 0x16c   :  { %v280_v57 = vadd.f32 1.0, %v692_v56  ;;  %v694_v58 = vpop.eup %693 }
 0x16d   :  { %v475_v59 = vadd.f32 1.0, %v694_v58 }
 0x16e   :  { %486 = vrot.lane.b32.xlu0 %v690_v53, %s879_s19  ;;  %695 = vrcp.f32 %v280_v57 }
 0x16f   :  { %697 = vrcp.f32 %v475_v59 }
 0x178   :  { %v696_v60 = vpop.eup %695 }
 0x179   :  { %v698_v63 = vpop.eup %697  ;;  %v289_v3 = vmul.f32 %v696_v60, %v287_v2 }
 0x17a   :  { %v484_v7 = vmul.f32 %v698_v63, %v482_v4 }
 0x1dc   :  { %v292_v61 = vpop.permute.xlu0 %291 }
 0x1dd   :  { %v294_v62 = vmul.f32 %v696_v60, %v292_v61 }
 0x1df   :  { %296 = vrot.lane.b32.xlu0 %v294_v62, %s878_s13 }
 0x1e0   :  { %v487_v0 = vpop.permute.xlu0 %486 }
 0x1e1   :  { %v489_v1 = vmul.f32 %v698_v63, %v487_v0 }
 0x1e3   :  { %491 = vrot.lane.b32.xlu1 %v489_v1, %s878_s13 }
 0x251   :  { %v297_v5 = vpop.permute.xlu0 %296 }
 0x252   :  { %v299_v6 = vadd.f32 %v297_v5, %v289_v3 }
 0x254   :  { %699 = vtanh.f32 %v299_v6 }
 0x255   :  { %v492_v8 = vpop.permute.xlu1 %491 }
 0x256   :  { %v494_v9 = vadd.f32 %v492_v8, %v484_v7 }
 0x258   :  { %701 = vtanh.f32 %v494_v9 }
 0x25e   :  { %v700_v10 = vpop.eup %699 }
 0x25f   :  { %302 = vrot.lane.b32.xlu0 %v700_v10, %s879_s19 }
 0x262   :  { %v702_v11 = vpop.eup %701 }
 0x263   :  { %497 = vrot.lane.b32.xlu1 %v702_v11, %s879_s19 }
 0x2d1   :  { %v303_v12 = vpop.permute.xlu0 %302 }
 0x2d2   :  { %v305_v13 = vmul.f32 %v696_v60, %v303_v12 }
 0x2d4   :  { %502 = vrot.lane.b32.xlu0 %v305_v13, %s878_s13 }
 0x2d5   :  { %v498_v14 = vpop.permute.xlu1 %497 }
 0x2d6   :  { %v500_v15 = vmul.f32 %v698_v63, %v498_v14 }
 0x2d8   :  { %506 = vrot.lane.b32.xlu1 %v500_v15, %s879_s19  ;;  %510 = vrot.lane.b32.xlu0 %v299_v6, %s878_s13 }
 0x2dc   :  { %514 = vrot.lane.b32.xlu1 %v494_v9, %s879_s19 }
 0x346   :  { %v503_v16 = vpop.permute.xlu0 %502 }
 0x34a   :  { %v507_v17 = vpop.permute.xlu1 %506  ;;  %v511_v19 = vpop.permute.xlu0 %510 }
 0x34b   :  { %v517_v18 = vsel %vm121_vm1, %v503_v16, %v507_v17 }
 0x34c   :  { %v518_v20 = vsel %vm195_vm2, %v517_v18, %v511_v19 }
 0x34e   :  { %v515_v21 = vpop.permute.xlu1 %514 }
 0x34f   :  { %v520_v22 = vsel %vm519_vm3, %v518_v20, %v515_v21 }
 0x350   :  { %521 = vst [vmem:[#allocation13] sm:$0xff] %v520_v22 }
 0x351   :  { %846 = shalt.err (!%p843_p10)
}
 0x352   :  { %s847_s15 = scalar_lea.hbm %s1070_s9, 128 }
 0x353   :  { %p848_p11 = scmp.ne.s32.totalorder %s1070_s9, %s847_s15  ;;  %p851_p12 = scmp.lt.u32.totalorder %s847_s15, %s1070_s9 }
 0x355   :  { %p853_p13 = pnand %p851_p12, %p848_p11 }
 0x357   :  { %856 = shalt.err (!%p853_p13)
}
 0x358   :  { %531 = dma.vmem_to_hbm [thread:$0]  %s529_s20, 128, %s1070_s9, [#allocation4]  }
 0x359   :  { %865 = dma.done.wait [#allocation4], 128  }
 0x35a   :  { %866 = vsyncadd [#allocation4], 4294967168 }
 0x35b   :  { %535 = vsyncpa [#allocation3], 1 }
 0x35c   :  { %536 = vsyncpa [#allocation6], 1 }
 0x35d   :  { %537 = vsyncpa [#allocation9], 1 }
 0x35e   :  { %538 = vsyncpa [#allocation12], 1 }
 0x35f   :  { %539 = vsyncpa [#allocation4], 1 }

</bundles_post_ra>
